<compile_context>
chip_gen: v6e
topology: v6e:2x2x1
jax: 0.10.0
libtpu: 0.0.40
codegen_flags: <defaults>
</compile_context>

<pallas_src>
import functools

import numpy as np

import jax
import jax.numpy as jnp
from jax.experimental import pallas as pl
from jax.experimental.pallas import tpu as pltpu


_VMEM_LIMIT_BYTES = 32 * 1024 * 1024        # explicit scoped-VMEM budget
_ATTN_VMEM_BUDGET = 16 * 1024 * 1024        # working-set budget for b_blk


# --------------------------------------------------------------------------
# tiling helpers
# --------------------------------------------------------------------------
def _pick_tile(size, cap, align, prefer=None):
    """Largest multiple of `align` that divides `size` and is <= cap.

    If `prefer` (e.g. 256 for the v6e/v7x MXU) divides `size`, prefer
    multiples of it. Falls back to the full dimension if `size` is not
    `align`-aligned (a full-extent block is always legal for the last 2 dims).
    TODO(synk): very large *unaligned* dims would fall back to a full-extent
                block; a padding path would bound VMEM in that case.
    """
    if size % align != 0:
        return size
    for a in ([prefer] if prefer else []) + [align]:
        if a and size % a == 0:
            best, t = 0, a
            while t <= min(cap, size):
                if size % t == 0:
                    best = t
                t += a
            if best:
                return best
    return size


def _split_for_cores(size, tile, align):
    """Try shrinking `tile` so size//tile >= 2 (keeps both v7x TCs busy)."""
    if size // tile >= 2 or tile <= align:
        return tile
    t = tile - align
    while t >= align:
        if size % t == 0 and size // t >= 2:
            return t
        t -= align
    return tile


def _attn_block_batch(BF, n, inner, itemsize, budget_bytes):
    """VMEM-derived batch block for the attention core (divides BF)."""
    per_slice = 2 * (n * 3 * inner + n * inner) * itemsize      # pipelined I/O
    per_slice += 4 * n * inner * 4 + 3 * n * n * 4              # f32 working set
    cap = max(1, budget_bytes // max(per_slice, 1))
    cap = min(cap, 64)
    if BF >= 2:
        cap = min(cap, max(1, BF // 2))   # >= 2 parallel grid steps (v7x 2 TCs)
    b_blk = 1
    for cand in range(1, min(cap, BF) + 1):
        if BF % cand == 0:
            b_blk = cand
    return b_blk


# --------------------------------------------------------------------------
# Pallas kernels
# --------------------------------------------------------------------------
def _matmul_kernel(x_ref, w_ref, o_ref, acc_ref):
    """o = x @ w (non-f32 output); f32 VMEM accumulator, K last grid axis."""
    @pl.when(pl.program_id(2) == 0)
    def _():
        acc_ref[...] = jnp.zeros_like(acc_ref)

    acc_ref[...] += jnp.dot(x_ref[...], w_ref[...],
                            preferred_element_type=jnp.float32)

    @pl.when(pl.program_id(2) == pl.num_programs(2) - 1)
    def _():
        o_ref[...] = acc_ref[...].astype(o_ref.dtype)


def _matmul_bias_kernel(x_ref, w_ref, b_ref, o_ref, acc_ref):
    """o = x @ w + b (non-f32 output)."""
    @pl.when(pl.program_id(2) == 0)
    def _():
        acc_ref[...] = jnp.zeros_like(acc_ref)

    acc_ref[...] += jnp.dot(x_ref[...], w_ref[...],
                            preferred_element_type=jnp.float32)

    @pl.when(pl.program_id(2) == pl.num_programs(2) - 1)
    def _():
        o_ref[...] = (acc_ref[...]
                      + b_ref[...].astype(jnp.float32)).astype(o_ref.dtype)


def _matmul_f32_kernel(x_ref, w_ref, o_ref):
    """o = x @ w, f32 output: accumulate directly into the resident o block."""
    @pl.when(pl.program_id(2) == 0)
    def _():
        o_ref[...] = jnp.zeros_like(o_ref)

    o_ref[...] += jnp.dot(x_ref[...], w_ref[...],
                          preferred_element_type=jnp.float32)


def _matmul_bias_f32_kernel(x_ref, w_ref, b_ref, o_ref):
    """o = x @ w + b, f32 output: no scratch accumulator."""
    @pl.when(pl.program_id(2) == 0)
    def _():
        o_ref[...] = jnp.zeros_like(o_ref)

    o_ref[...] += jnp.dot(x_ref[...], w_ref[...],
                          preferred_element_type=jnp.float32)

    @pl.when(pl.program_id(2) == pl.num_programs(2) - 1)
    def _():
        o_ref[...] += b_ref[...].astype(jnp.float32)


def _attn_kernel(qkv_ref, o_ref, *, scale, heads, dim_head, inner):
    """Head-fused attention over a block of (batch*frame) slices.

    qkv_ref block: (B_blk, n, 3*inner) with columns [q | k | v], each head-major.
    o_ref   block: (B_blk, n, inner).
    Per head: sim = q @ k^T * scale ; softmax ; out = attn @ v.
    All HBM I/O is lane-dense (128+ lanes); per-head slicing happens in VMEM.
    """
    outs = []
    for hh in range(heads):
        q = qkv_ref[:, :, pl.ds(hh * dim_head, dim_head)]              # (B,n,d)
        k = qkv_ref[:, :, pl.ds(inner + hh * dim_head, dim_head)]      # (B,n,d)
        v = qkv_ref[:, :, pl.ds(2 * inner + hh * dim_head, dim_head)]  # (B,n,d)

        sim = jnp.einsum('bid,bjd->bij', q, k,
                         preferred_element_type=jnp.float32)           # (B,n,n)
        sim = sim * scale                      # scale the (n,n) sim, not q
        # numerically-stable softmax (f32 elementwise — v5e has no bf16 VPU/EUP)
        sim = sim - jnp.max(sim, axis=-1, keepdims=True)
        p = jnp.exp(sim)
        inv_denom = pl.reciprocal(jnp.sum(p, axis=-1, keepdims=True),
                                  approx=True)
        attn = p * inv_denom
        out_h = jnp.einsum('bij,bjd->bid', attn.astype(v.dtype), v,
                           preferred_element_type=jnp.float32)          # (B,n,d)
        outs.append(out_h)

    # single lane-dense store of the fused-head output block
    o_ref[...] = jnp.concatenate(outs, axis=-1).astype(o_ref.dtype)


# --------------------------------------------------------------------------
# Wrappers around pallas_call
# --------------------------------------------------------------------------
def pallas_linear(x2d, w, b=None, *, tm_cap=512, tn_cap=512, tk_cap=1024,
                  out_dtype=None):
    """x2d:(M,K)  w:(K,N)  b:(N,) or None  -> (M,N).

    Tiled, pipelined matmul. Output lane dims prefer 256 alignment (full
    256x256 MXU passes on v6e/v7x), sublane tiles align to 16 for bf16
    operands. f32 outputs accumulate directly into the resident output block;
    other dtypes use an f32 VMEM accumulator.
    """
    M, K = x2d.shape
    K2, N = w.shape
    assert K == K2
    out_dtype = out_dtype if out_dtype is not None else x2d.dtype

    m_align = 16 if x2d.dtype == jnp.bfloat16 else 8
    tm = _pick_tile(M, tm_cap, m_align)
    tn = _pick_tile(N, tn_cap, 128, prefer=256)
    tk = _pick_tile(K, tk_cap, 128, prefer=256)

    # v7x has 2 TensorCores sharded over "parallel" axes: make sure the (M, N)
    # parallel grid has >= 2 steps when the problem allows it.
    if (M // tm) * (N // tn) < 2:
        tm2 = _split_for_cores(M, tm, m_align)
        if M // tm2 >= 2:
            tm = tm2
        else:
            tn2 = _split_for_cores(N, tn, 128)
            if N // tn2 >= 2:
                tn = tn2

    grid = (M // tm, N // tn, K // tk)

    x_spec = pl.BlockSpec((tm, tk), lambda i, j, k: (i, k))
    w_spec = pl.BlockSpec((tk, tn), lambda i, j, k: (k, j))
    o_spec = pl.BlockSpec((tm, tn), lambda i, j, k: (i, j))
    cparams = pltpu.CompilerParams(
        dimension_semantics=("parallel", "parallel", "arbitrary"),
        vmem_limit_bytes=_VMEM_LIMIT_BYTES)

    direct = np.dtype(out_dtype) == np.dtype(jnp.float32)
    scratch = [] if direct else [pltpu.VMEM((tm, tn), jnp.float32)]

    if b is None:
        kernel = _matmul_f32_kernel if direct else _matmul_kernel
        in_specs = [x_spec, w_spec]
        operands = (x2d, w)
    else:
        kernel = _matmul_bias_f32_kernel if direct else _matmul_bias_kernel
        b_spec = pl.BlockSpec((1, tn), lambda i, j, k: (0, j))
        in_specs = [x_spec, w_spec, b_spec]
        operands = (x2d, w, b.reshape(1, N))

    return pl.pallas_call(
        kernel,
        out_shape=jax.ShapeDtypeStruct((M, N), out_dtype),
        grid=grid,
        in_specs=in_specs,
        out_specs=o_spec,
        scratch_shapes=scratch,
        compiler_params=cparams,
    )(*operands)


def pallas_attention_core(qkv, scale, *, heads, dim_head,
                          vmem_budget=_ATTN_VMEM_BUDGET):
    """qkv: (BF, n, 3*inner) fused [q|k|v], head-major  ->  (BF, n, inner).

    BF = batch * frames (the attention groups). The grid iterates over blocks
    of b_blk slices; q/k/v and the per-head splits are taken as static in-VMEM
    slices of the single fused block, so the HBM side stays lane-dense and the
    wrapper needs no transposes / splits.
    """
    BF, n, three_inner = qkv.shape
    inner = heads * dim_head
    assert three_inner == 3 * inner

    b_blk = _attn_block_batch(BF, n, inner, qkv.dtype.itemsize, vmem_budget)
    grid = (BF // b_blk,)

    kernel = functools.partial(_attn_kernel, scale=scale, heads=heads,
                               dim_head=dim_head, inner=inner)
    in_spec = pl.BlockSpec((b_blk, n, 3 * inner), lambda i: (i, 0, 0))
    out_spec = pl.BlockSpec((b_blk, n, inner), lambda i: (i, 0, 0))

    return pl.pallas_call(
        kernel,
        out_shape=jax.ShapeDtypeStruct((BF, n, inner), qkv.dtype),
        grid=grid,
        in_specs=[in_spec],
        out_specs=out_spec,
        compiler_params=pltpu.CompilerParams(
            dimension_semantics=("parallel",),
            vmem_limit_bytes=_VMEM_LIMIT_BYTES),
    )(qkv)


# --------------------------------------------------------------------------
# Attention module (forward pass)
# --------------------------------------------------------------------------
def attention_forward(x, params, *, heads, dim_head, frames,
                      compute_dtype=jnp.bfloat16):
    """TimeSformer Attention.forward with einops_from='b (f n) d',
    einops_to='(b f) n d' (spatial attention), mask=None, rot_emb=None,
    dropout=0.0.

    compute_dtype: matmul-operand dtype (bf16 recommended on v6e/v7x; all
    accumulation and softmax elementwise math stays f32).
    """
    b, seq, dim = x.shape
    inner = heads * dim_head
    scale = dim_head ** -0.5
    assert seq % frames == 0
    n_sp = seq // frames
    in_dtype = x.dtype

    xc = x.astype(compute_dtype)
    w_qkv = params["w_qkv"].astype(compute_dtype)   # (dim, 3*inner), [q|k|v] head-major
    w_out = params["w_out"].astype(compute_dtype)   # (inner, dim)
    b_out = params["b_out"].astype(jnp.float32)     # bias added in f32 in-kernel

    # ---- to_qkv (no bias): tiled Pallas matmul ---------------------------
    qkv = pallas_linear(xc.reshape(b * seq, dim), w_qkv)       # (b*seq, 3*inner)

    # 'b (f n) (three h d)' -> '(b f) n (three h d)' is a pure reshape: no
    # HBM transpose and no q/k/v split materialization.
    qkv = qkv.reshape(b * frames, n_sp, 3 * inner)

    # ---- attention core (per-head split happens inside the kernel) -------
    out = pallas_attention_core(qkv, scale, heads=heads, dim_head=dim_head)

    # '(b f) n (h d)' -> '(b (f n)) (h d)' is again a pure reshape.
    out = out.reshape(b * seq, inner)

    # ---- to_out (Linear with bias): tiled Pallas matmul -------------------
    y = pallas_linear(out, w_out, b_out)                       # (b*seq, dim)
    return y.reshape(b, seq, dim).astype(in_dtype)


# --------------------------------------------------------------------------
# Pure-JAX reference (for a correctness check)
# --------------------------------------------------------------------------
def attention_reference(x, params, *, heads, dim_head, frames):
    b, seq, dim = x.shape
    h, inner = heads, heads * dim_head
    scale = dim_head ** -0.5
    n_sp = seq // frames
    qkv = x @ params["w_qkv"]
    q, k, v = jnp.split(qkv, 3, axis=-1)
    sh = lambda t: t.reshape(b, seq, h, dim_head).transpose(0, 2, 1, 3).reshape(
        b * h, seq, dim_head)
    q, k, v = map(sh, (q, k, v))
    q = q * scale
    ts = lambda t: t.reshape(b * h * frames, n_sp, dim_head)
    q_, k_, v_ = map(ts, (q, k, v))
    sim = jnp.einsum("bid,bjd->bij", q_, k_)
    attn = jax.nn.softmax(sim, axis=-1)
    out = jnp.einsum("bij,bjd->bid", attn, v_)
    out = out.reshape(b, h, seq, dim_head).transpose(0, 2, 1, 3).reshape(
        b, seq, inner)
    return out @ params["w_out"] + params["b_out"]


# --------------------------------------------------------------------------
if __name__ == "__main__":
    # small, TPU-friendly shapes (lane dims are multiples of 128, sublane dims
    # multiples of 8/16, so every BlockSpec satisfies the (8,128) tiling rule)
    dim = 128
    heads = 4
    dim_head = 32
    inner_dim = heads * dim_head            # 128
    batch = 2
    frames = 2
    n_spatial = 16
    seq = frames * n_spatial                # 32

    key = jax.random.PRNGKey(0)
    k_x, k_qkv, k_out, k_b = jax.random.split(key, 4)

    x = jax.random.normal(k_x, (batch, seq, dim), dtype=jnp.float32)
    params = {
        # nn.Linear(dim, 3*inner, bias=False).weight is (3*inner, dim);
        # we store its transpose so kernels compute x @ w. Column order is
        # [q|k|v] x head-major, dim_head-minor (matches .chunk + einops).
        "w_qkv": jax.random.normal(k_qkv, (dim, 3 * inner_dim),
                                   dtype=jnp.float32) * 0.05,
        "w_out": jax.random.normal(k_out, (inner_dim, dim),
                                   dtype=jnp.float32) * 0.05,
        "b_out": jax.random.normal(k_b, (dim,), dtype=jnp.float32) * 0.01,
    }

    # fast path: bf16 matmul operands (v6e/v7x MXU-native), f32 accumulation
    out_bf16 = attention_forward(x, params, heads=heads, dim_head=dim_head,
                                 frames=frames, compute_dtype=jnp.bfloat16)
    # exact path: f32 operands (tight correctness check)
    out_f32 = attention_forward(x, params, heads=heads, dim_head=dim_head,
                                frames=frames, compute_dtype=jnp.float32)
    out_bf16, out_f32 = jax.block_until_ready((out_bf16, out_f32))

    ref = attention_reference(x, params, heads=heads, dim_head=dim_head,
                              frames=frames)
    assert out_f32.shape == (batch, seq, dim)
    assert out_bf16.shape == (batch, seq, dim)
    # f32 path: only the approx (EUP) reciprocal perturbs the result
    assert jnp.allclose(out_f32, ref, atol=3e-3, rtol=3e-3), "f32 mismatch"
    # bf16-operand path: bf16 rounding of activations/weights
    assert jnp.allclose(out_bf16, ref, atol=5e-2, rtol=5e-2), "bf16 mismatch"

    print("KERNEL_OK")
</pallas_src>

<mosaic_0001>
module attributes {stable_mosaic.version = 11 : i64} {
  func.func @_matmul_kernel(%arg0: i32, %arg1: i32, %arg2: i32, %arg3: memref<32x128xbf16, #tpu.memory_space<vmem>>, %arg4: memref<128x384xbf16, #tpu.memory_space<vmem>>, %arg5: memref<32x384xbf16, #tpu.memory_space<vmem>>, %arg6: memref<32x384xf32, #tpu.memory_space<vmem>>) attributes {dimension_semantics = [#tpu.dimension_semantics<parallel>, #tpu.dimension_semantics<parallel>, #tpu.dimension_semantics<arbitrary>], iteration_bounds = array<i64: 2, 1, 1>, scalar_prefetch = 0 : i64, scratch_operands = 1 : i64, tpu.core_type = #tpu.core_type<tc>, window_params = [{transform_indices = @transform_0, window_bounds = array<i64: 32, 128>}, {transform_indices = @transform_1, window_bounds = array<i64: 128, 384>}, {transform_indices = @transform_2, window_bounds = array<i64: 32, 384>}]} {
    %c0_i32 = arith.constant 0 : i32
    %0 = arith.cmpi eq, %arg2, %c0_i32 : i32
    %1 = arith.extui %0 : i1 to i32
    %c0_i32_0 = arith.constant 0 : i32
    %2 = arith.cmpi ne, %1, %c0_i32_0 : i32
    scf.if %2 {
      %cst_10 = arith.constant 0.000000e+00 : f32
      %12 = vector.broadcast %cst_10 : f32 to vector<32x384xf32>
      %c0_11 = arith.constant 0 : index
      %c0_12 = arith.constant 0 : index
      %13 = vector.load %arg6[%c0_11, %c0_12] : memref<32x384xf32, #tpu.memory_space<vmem>>, vector<32x384xf32>
      tpu.vector_store %arg6[%c0_11, %c0_12], %12 {strides = array<i32>} : memref<32x384xf32, #tpu.memory_space<vmem>>, vector<32x384xf32>,
    } else {
    }
    %c0 = arith.constant 0 : index
    %c0_1 = arith.constant 0 : index
    %3 = vector.load %arg6[%c0, %c0_1] : memref<32x384xf32, #tpu.memory_space<vmem>>, vector<32x384xf32>
    %c0_2 = arith.constant 0 : index
    %c0_3 = arith.constant 0 : index
    %4 = vector.load %arg3[%c0_2, %c0_3] : memref<32x128xbf16, #tpu.memory_space<vmem>>, vector<32x128xbf16>
    %c0_4 = arith.constant 0 : index
    %c0_5 = arith.constant 0 : index
    %5 = vector.load %arg4[%c0_4, %c0_5] : memref<128x384xbf16, #tpu.memory_space<vmem>>, vector<128x384xbf16>
    %cst = arith.constant dense<0.000000e+00> : vector<32x384xf32>
    %6 = tpu.matmul %4, %5, %cst {dimension_numbers = #tpu.dot_dimension_numbers<[1], [0], [0], [1], [0, 0, 1, 1], [], []>} : vector<32x128xbf16>, vector<128x384xbf16>, vector<32x384xf32> -> vector<32x384xf32>
    %7 = arith.addf %3, %6 : vector<32x384xf32>
    %c0_6 = arith.constant 0 : index
    %c0_7 = arith.constant 0 : index
    %8 = vector.load %arg6[%c0_6, %c0_7] : memref<32x384xf32, #tpu.memory_space<vmem>>, vector<32x384xf32>
    tpu.vector_store %arg6[%c0_6, %c0_7], %7 {strides = array<i32>} : memref<32x384xf32, #tpu.memory_space<vmem>>, vector<32x384xf32>,
    %c0_i32_8 = arith.constant 0 : i32
    %9 = arith.cmpi eq, %arg2, %c0_i32_8 : i32
    %10 = arith.extui %9 : i1 to i32
    %c0_i32_9 = arith.constant 0 : i32
    %11 = arith.cmpi ne, %10, %c0_i32_9 : i32
    scf.if %11 {
      %c0_10 = arith.constant 0 : index
      %c0_11 = arith.constant 0 : index
      %12 = vector.load %arg6[%c0_10, %c0_11] : memref<32x384xf32, #tpu.memory_space<vmem>>, vector<32x384xf32>
      %13 = arith.truncf %12 : vector<32x384xf32> to vector<32x384xbf16>
      %c0_12 = arith.constant 0 : index
      %c0_13 = arith.constant 0 : index
      %14 = vector.load %arg5[%c0_12, %c0_13] : memref<32x384xbf16, #tpu.memory_space<vmem>>, vector<32x384xbf16>
      tpu.vector_store %arg5[%c0_12, %c0_13], %13 {strides = array<i32>} : memref<32x384xbf16, #tpu.memory_space<vmem>>, vector<32x384xbf16>,
    } else {
    }
    return
  }
  func.func @transform_0(%arg0: i32, %arg1: i32, %arg2: i32) -> (i32, i32) {
    %c0_i32 = arith.constant 0 : i32
    return %arg0, %arg2 : i32, i32
  }
  func.func @transform_1(%arg0: i32, %arg1: i32, %arg2: i32) -> (i32, i32) {
    %c0_i32 = arith.constant 0 : i32
    return %arg2, %arg1 : i32, i32
  }
  func.func @transform_2(%arg0: i32, %arg1: i32, %arg2: i32) -> (i32, i32) {
    %c0_i32 = arith.constant 0 : i32
    return %arg0, %arg1 : i32, i32
  }
}

</mosaic_0001>

<bundles_post_ra>
// kernel: tpu_custom_call.1
= control target key start
LH: loop header
LB: loop body
LE: loop exit
PB: predicated region body
PF: predicated region fallthrough
CT: control target
= control target key end

     0   :  { %7 = vsyncpa [#allocation4], 0  ;;  %s1290_s0 = inlined_call_operand.hbm [shape: bf16[64,128], index: 0, kind: input, shape index: {}]   ;;  %s1291_s1 = inlined_call_operand.hbm [shape: bf16[128,384], index: 1, kind: input, shape index: {}]   ;;  %s1292_s2 = inlined_call_operand.hbm [shape: bf16[64,384], index: 2, kind: output, shape index: {}]  }
   0x1   :  { %9 = vsyncpa [#allocation4 + $0x1], 0 }
   0x2   :  { %10 = vsyncpa [#allocation7], 0 }
   0x3   :  { %11 = vsyncpa [#allocation5], 0 }
   0x4   :  { %13 = vsyncpa [#allocation5 + $0x1], 0  ;;  %s1104_s9 = smov 0   ;;  %s1106_s10 = smov 0  }
   0x5   :  { %s1108_s11 = smov 0   ;;  %s1110_s12 = smov 0  }
   0x6   :  { %s1112_s13 = smov 0   ;;  %s1114_s14 = smov 0  }
   0x7 LB: > { %s734_s15 = sadd.s32 4294967295, %s1077_s14   ;;  %s735_s16 = sadd.s32 4294967294, %s1077_s14   ;;  %s1077_s14 = sphi %s1114_s14, %s19_s14   ;;  %s1073_s13 = sphi %s1112_s13, %s1310_s13   ;;  %s1069_s12 = sphi %s1110_s12, %s1309_s12   ;;  %s1065_s11 = sphi %s1108_s11, %s1308_s11   ;;  %s1061_s10 = sphi %s1106_s10, %s1307_s10   ;;  %s1057_s9 = sphi %s1104_s9, %s1306_s9  }
   0x8   : > { %p60_p0 = scmp.ne.s32.totalorder %s1061_s10, %s1057_s9  ;;  %p1138_p1 = scmp.eq.s32.totalorder %s734_s15, 0 }
   0x9   : > { %p1142_p2 = scmp.eq.s32.totalorder %s734_s15, 1  ;;  %p120_p3 = scmp.eq.s32.totalorder %s735_s16, 1 }
   0xa   : > { %p1148_p4 = por %p1138_p1, %p60_p0  ;;  %p736_p5 = scmp.ge.s32.totalorder %s1077_s14, 1 }
   0xb   : > { %p1153_p6 = por %p120_p3, %p60_p0  ;;  %p127_p7 = scmp.lt.s32.totalorder %s1077_s14, 3 }
   0xc   : > { %s1296_s19 = scalar_select %p1148_p4, 1, 0 }
   0xd   : > { %s1297_s20 = scalar_select %p1153_p6, 1, 0 }
   0xe   : > { %p1158_p8 = pnand %p736_p5, %p127_p7  ;;  %s1079_s22 = smov [#allocation6]  }
   0xf   : > { %s145_s23 = sshll.u32 %s1079_s22, 4  ;;  %s38_s25 = sadd.s32 1, %s1073_s13  ;;  %s146_s23 = int_to_ptr.vmem [resolvable:$true] %s145_s23 }
  0x10   : > { %p833_p9 = pneg %p1158_p8  ;;  %s950_s26 = scalar_lea.vmem %s146_s23, 3072 }
  0x11   : > { %p951_p13 = scmp.ne.s32.totalorder %s146_s23, %s950_s26  ;;  %p958_p5 = scmp.lt.s32.totalorder %s146_s23, %s146_s23 }
  0x12   : > { %p1167_p11 = pnand %p833_p9, %p1138_p1  ;;  %p959_p7 = scmp.lt.s32.totalorder %s950_s26, %s950_s26 }
  0x14   : > { %p941_p12 = pneg %p1167_p11  ;;  %p960_p6 = por %p959_p7, %p958_p5 }
  0x16   : > { %p953_p0 = pnand %p951_p13, %p941_p12 }
  0x18   : > { %p954_p3 = pneg %p953_p0 }
  0x1a   : > { %p961_p4 = pnand %p960_p6, %p954_p3 }
  0x1c   : > { %964 = shalt.err (!%p961_p4)
}
  0x1d   : > { %s1080_s27 = smov 192   ;;  %s1081_s28 = smov 12  }
  0x1e   : > { %836 = dma.hbm_to_vmem [thread:$0]  (!%p1167_p11), %s1291_s1, 3072, %s146_s23, [#allocation7], %s1080_s27, %s1080_s27, %s1081_s28  }
  0x1f   : > { %p40_p6 = scmp.ge.s32.totalorder %s38_s25, 2  ;;  %s47_s3 = sadd.s32 1, %s1065_s11 }
  0x20   : > { %p54_p4 = scmp.ne.s32.totalorder %s1065_s11, %s1061_s10  ;;  %p55_p9 = scmp.eq.s32.totalorder %s1077_s14, 0 }
  0x21   : > { %s1312_s25 = smov (%p40_p6, %s38_s25), 0  ;;  %p846_p0 = scmp.lt.s32.totalorder %s1077_s14, 2 }
  0x22   : > { %p1185_p12 = por %p55_p9, %p54_p4  ;;  %p1191_p13 = por %p1142_p2, %p54_p4 }
  0x23   : > { %s42_s6 = ssub.s32 %s1073_s13, %s1312_s25  ;;  %s159_s7 = sand.u32 1, %s1065_s11  }
  0x24   : > { %p45_p11 = scmp.eq.s32.totalorder %s42_s6, 0  ;;  %s739_s8 = sshll.u32 %s159_s7, 4 }
  0x25   : > { %s784_s16 = sshll.u32 %s1073_s13, 8  ;;  %s163_s26 = scalar_lea.vmem [#allocation3], %s739_s8 }
  0x26   : > { %s1200_s15 = scalar_select %p45_p11, %s1065_s11, %s47_s3  }
  0x27   : > { %s170_s24 = scalar_lea.hbm %s1290_s0, %s784_s16  ;;  %s171_s27 = sshll.u32 %s163_s26, 4  ;;  %s172_s27 = int_to_ptr.vmem [resolvable:$true] %s171_s27 }
  0x28   : > { %p1208_p2 = pnand %p846_p0, %p1185_p12  ;;  %s160_s28 = scalar_lea.sflag [#allocation4], %s159_s7 }
  0x29   : > { %s978_s29 = scalar_lea.vmem %s172_s27, 256  ;;  %s1082_s30 = smov [#allocation3]  }
  0x2a   : > { %p967_p3 = pneg %p1208_p2  ;;  %p979_p5 = scmp.ne.s32.totalorder %s172_s27, %s978_s29 }
  0x2b   : > { %s983_s3 = sshll.u32 %s1082_s30, 4  ;;  %s984_s3 = int_to_ptr.vmem [resolvable:$false] %s983_s3 }
  0x2c   : > { %p981_p7 = pnand %p979_p5, %p967_p3  ;;  %s985_s6 = scalar_lea.vmem %s984_s3, 512 }
  0x2d   : > { %p986_p4 = scmp.lt.s32.totalorder %s172_s27, %s984_s3  ;;  %p987_p9 = scmp.lt.s32.totalorder %s985_s6, %s978_s29 }
  0x2e   : > { %p982_p6 = pneg %p981_p7 }
  0x2f   : > { %p988_p11 = por %p987_p9, %p986_p4 }
  0x31   : > { %p989_p10 = pnand %p988_p11, %p982_p6 }
  0x33   : > { %992 = shalt.err (!%p989_p10)
}
  0x34   : > { %s1083_s4 = smov 64   ;;  %s1084_s8 = smov 4  }
  0x35   : > { %840 = dma.hbm_to_vmem [thread:$0]  (!%p1208_p2), %s170_s24, 256, %s172_s27, %s160_s28, %s1083_s4, %s1083_s4, %s1084_s8  }
  0x36   : > { %183 = sbr.rel (%p1158_p8) target bundleno = 318 (0x13e), region = 28  ;;  %s1219_s7 = sand.u32 (!%p1158_p8), 1, %s1061_s10  }
  0x37   : > { %s743_s16 = sshll.u32 (!%p1158_p8), %s1219_s7, 4  ;;  %s186_s22 = scalar_lea.sflag (!%p1158_p8), [#allocation4], %s1219_s7 }
  0x38   : > { %s1223_s23 = scalar_lea.vmem (!%p1158_p8), [#allocation3], %s743_s16  ;;  %p1303_p12 = scmp.ne.s32.totalorder (!%p1158_p8), %s1296_s19, 0 }
  0x3b   : > { %1044 = dma.done.wait (%p1303_p12), %s186_s22, 256  }
  0x3c   : > { %1046 = vsyncadd (%p1303_p12), %s186_s22, 4294967040 }
  0x3d   : > { %1048 = dma.done.wait (%p1138_p1), [#allocation7], 3072  }
  0x3e   : > { %1050 = vsyncadd (%p1138_p1), [#allocation7], 4294964224  ;;  %v1085_v0 = vmov 0   ;;  %v905_v1 = vld [vmem:[#allocation6 + $0xac] ss:$12 sps:$4 sm:$0xff]   ;;  %v937_v19 = vld [vmem:[%s1223_s23] sm:$0xff]  }
  0x3f   : > { %456 = vmatprep.mubr.bf16.mxu0 %v1085_v0  ;;  %v907_v2 = vld [vmem:[#allocation6 + $0xa8] ss:$12 sps:$4 sm:$0xff]   ;;  %424 = vmatprep.subr.bf16.mxu0 %v905_v1  ;;  %v908_v3 = vld [vmem:[#allocation6 + $0xb0] ss:$12 sps:$4 sm:$0xff]   ;;  %v912_v6 = vld [vmem:[#allocation6 + $0x98] ss:$12 sps:$4 sm:$0xff]  }
  0x40   : > { %425 = vmatpush1.bf16.msra.mxu0 %v907_v2  ;;  %v909_v4 = vld [vmem:[#allocation6 + $0x94] ss:$12 sps:$4 sm:$0xff]   ;;  %v911_v5 = vld [vmem:[#allocation6 + $0x90] ss:$12 sps:$4 sm:$0xff]   ;;  %803 = vmatprep.subr.bf16.mxu1 %v908_v3  ;;  %v915_v9 = vld [vmem:[#allocation6 + $0x78] ss:$12 sps:$4 sm:$0xff]  }
  0x41   : > { %804 = vmatpush3.bf16.msra.mxu1 %v908_v3  ;;  %426 = vmatprep.subr.bf16.mxu0 %v909_v4  ;;  %v913_v7 = vld [vmem:[#allocation6 + $0x7c] ss:$12 sps:$4 sm:$0xff]   ;;  %v916_v8 = vld [vmem:[#allocation6 + $0x80] ss:$12 sps:$4 sm:$0xff]   ;;  %v917_v10 = vld [vmem:[#allocation6 + $0x64] ss:$12 sps:$4 sm:$0xff]  }
  0x42   : > { %805 = vmatprep.subr.bf16.mxu1 %v912_v6  ;;  %v920_v11 = vld [vmem:[#allocation6 + $0x68] ss:$12 sps:$4 sm:$0xff]   ;;  %v919_v12 = vld [vmem:[#allocation6 + $0x60] ss:$12 sps:$4 sm:$0xff]   ;;  %v924_v14 = vld [vmem:[#allocation6 + $0x50] ss:$12 sps:$4 sm:$0xff]   ;;  %819 = vmatprep.mubr.bf16.mxu1 %v937_v19 }
  0x43   : > { %v921_v13 = vld [vmem:[#allocation6 + $0x4c] ss:$12 sps:$4 sm:$0xff]   ;;  %v923_v15 = vld [vmem:[#allocation6 + $0x48] ss:$12 sps:$4 sm:$0xff]   ;;  %v927_v17 = vld [vmem:[#allocation6 + $0x30] ss:$12 sps:$4 sm:$0xff]  }
  0x44   : > { %427 = vmatpush1.bf16.msra.mxu0 %v911_v5  ;;  %v925_v16 = vld [vmem:[#allocation6 + $0x34] ss:$12 sps:$4 sm:$0xff]   ;;  %v928_v18 = vld [vmem:[#allocation6 + $0x38] ss:$12 sps:$4 sm:$0xff]   ;;  %v929_v20 = vld [vmem:[#allocation6 + $0x1c] ss:$12 sps:$4 sm:$0xff]  }
  0x45   : > { %428 = vmatprep.subr.bf16.mxu0 %v913_v7  ;;  %806 = vmatpush3.bf16.msra.mxu1 %v912_v6  ;;  %v932_v21 = vld [vmem:[#allocation6 + $0x20] ss:$12 sps:$4 sm:$0xff]   ;;  %v931_v22 = vld [vmem:[#allocation6 + $0x18] ss:$12 sps:$4 sm:$0xff]   ;;  %v936_v24 = vld [vmem:[#allocation6 + $0x8] ss:$12 sps:$4 sm:$0xff]  }
  0x46   : > { %807 = vmatprep.subr.bf16.mxu1 %v916_v8  ;;  %v933_v23 = vld [vmem:[#allocation6 + $0x4] ss:$12 sps:$4 sm:$0xff]   ;;  %v935_v25 = vld [vmem:[#allocation6] ss:$12 sps:$4 sm:$0xff]   ;;  %s823_s17 = smul.u32 48, %s1219_s7  ;;  %s614_s28 = scalar_lea.sflag [#allocation5], %s1219_s7 }
  0x47   : > { %v938_v26 = vld [vmem:[%s1223_s23 + $0x8] sm:$0xff]   ;;  %s824_s24 = smul.u32 768, %s1069_s12  ;;  %s1086_s12 = smov [#allocation8]  }
  0x48   : > { %429 = vmatpush1.bf16.msra.mxu0 %v915_v9  ;;  %s213_s19 = scalar_lea.vmem [#allocation8], %s823_s17  ;;  %s997_s30 = sshll.u32 %s1086_s12, 4  ;;  %s998_s30 = int_to_ptr.vmem [resolvable:$false] %s997_s30 }
  0x49   : > { %430 = vmatprep.subr.bf16.mxu0 %v917_v10  ;;  %808 = vmatpush3.bf16.msra.mxu1 %v916_v8  ;;  %s630_s21 = sshll.u32 %s213_s19, 4  ;;  %s1242_s18 = scalar_lea.hbm %s1292_s2, %s824_s24  ;;  %s1237_s21 = int_to_ptr.vmem [resolvable:$true] %s630_s21 }
  0x4a   : > { %809 = vmatprep.subr.bf16.mxu1 %v920_v11  ;;  %s993_s29 = scalar_lea.vmem %s1237_s21, 768  ;;  %s999_s3 = scalar_lea.vmem %s998_s30, 1536 }
  0x4b   : > { %p994_p1 = scmp.ne.s32.totalorder %s1237_s21, %s993_s29  ;;  %p1000_p0 = scmp.lt.s32.totalorder %s1237_s21, %s998_s30 }
  0x4c   : > { %431 = vmatpush1.bf16.msra.mxu0 %v919_v12  ;;  %p1001_p2 = scmp.lt.s32.totalorder %s999_s3, %s993_s29 }
  0x4d   : > { %432 = vmatprep.subr.bf16.mxu0 %v921_v13  ;;  %810 = vmatpush3.bf16.msra.mxu1 %v920_v11  ;;  %p995_p8 = pnand %p994_p1, %p1191_p13 }
  0x4e   : > { %811 = vmatprep.subr.bf16.mxu1 %v924_v14  ;;  %p1002_p3 = por %p1001_p2, %p1000_p0 }
  0x4f   : > { %p996_p10 = pneg %p995_p8 }
  0x50   : > { %433 = vmatpush1.bf16.msra.mxu0 %v923_v15 }
  0x51   : > { %434 = vmatprep.subr.bf16.mxu0 %v925_v16  ;;  %812 = vmatpush3.bf16.msra.mxu1 %v924_v14  ;;  %p1003_p5 = pnand %p1002_p3, %p996_p10 }
  0x52   : > { %813 = vmatprep.subr.bf16.mxu1 %v928_v18 }
  0x54   : > { %435 = vmatpush1.bf16.msra.mxu0 %v927_v17 }
  0x55   : > { %436 = vmatprep.subr.bf16.mxu0 %v929_v20  ;;  %814 = vmatpush3.bf16.msra.mxu1 %v928_v18 }
  0x56   : > { %815 = vmatprep.subr.bf16.mxu1 %v932_v21 }
  0x58   : > { %437 = vmatpush1.bf16.msra.mxu0 %v931_v22 }
  0x59   : > { %438 = vmatprep.subr.bf16.mxu0 %v933_v23  ;;  %816 = vmatpush3.bf16.msra.mxu1 %v932_v21 }
  0x5a   : > { %817 = vmatprep.subr.bf16.mxu1 %v936_v24 }
  0x5c   : > { %439 = vmatpush1.bf16.msra.mxu0 %v935_v25 }
  0x5d   : > { %818 = vmatpush3.bf16.msra.mxu1 %v936_v24 }
  0x5f   : > { %457 = vmatmul.mubr.bf16.vlgmr.msra.gmra.mxu0 %v937_v19 }
  0x60   : > { %466 = vmatprep.mubr.bf16.mxu0 %v1085_v0  ;;  %820 = vmatmul.mubr.bf16.vlgmr.msra.gmra.mxu1 %v938_v26 }
  0x67   : > { %467 = vmatmul.mubr.bf16.gmra.mxu0 %v938_v26 }
 0x11f   : > { %v458_v27 = vpop.f32.mrf.mxu0 }
 0x120   : > { %v821_v29 = vpop.f32.mrf.mxu1 }
 0x121   : > { %v460_v28 = vpop.f32.mrf.mxu0  ;;  %v790_v31 = vpack.c.bf16 %v821_v29, %v821_v29 }
 0x122   : > { %v785_v30 = vpack.c.bf16 %v460_v28, %v458_v27  ;;  %v511_v33 = vpop.f32.mrf.mxu1 }
 0x123   : > { %v462_v32 = vpop.f32.mrf.mxu0  ;;  %610 = vst [vmem:[%s213_s19 + $0x20] sm:$0xf] %v790_v31  ;;  %v786_v34 = vpack.c.bf16 %v511_v33, %v511_v33 }
 0x124   : > { %605 = vst [vmem:[%s213_s19] sm:$0xff] %v785_v30  ;;  %v822_v36 = vpop.f32.mrf.mxu1 }
 0x125   : > { %v464_v35 = vpop.f32.mrf.mxu0  ;;  %606 = vst [vmem:[%s213_s19 + $0x8] sm:$0xf] %v786_v34  ;;  %v792_v38 = vpack.c.bf16 %v822_v36, %v822_v36 }
 0x126   : > { %v787_v37 = vpack.c.bf16 %v464_v35, %v462_v32  ;;  %v514_v40 = vpop.f32.mrf.mxu1 }
 0x127   : > { %v468_v39 = vpop.f32.mrf.mxu0  ;;  %612 = vst [vmem:[%s213_s19 + $0x2c] sm:$0xf] %v792_v38  ;;  %v788_v41 = vpack.c.bf16 %v514_v40, %v514_v40 }
 0x128   : > { %607 = vst [vmem:[%s213_s19 + $0xc] sm:$0xff] %v787_v37 }
 0x129   : > { %v470_v42 = vpop.f32.mrf.mxu0  ;;  %608 = vst [vmem:[%s213_s19 + $0x14] sm:$0xf] %v788_v41 }
 0x12a   : > { %v789_v43 = vpack.c.bf16 %v470_v42, %v468_v39 }
 0x12b   : > { %v472_v44 = vpop.f32.mrf.mxu0 }
 0x12c   : > { %609 = vst [vmem:[%s213_s19 + $0x18] sm:$0xff] %v789_v43 }
 0x12d   : > { %v474_v45 = vpop.f32.mrf.mxu0 }
 0x12e   : > { %v791_v46 = vpack.c.bf16 %v474_v45, %v472_v44 }
 0x130   : > { %611 = vst [vmem:[%s213_s19 + $0x24] sm:$0xff] %v791_v46 }
 0x131   : > { %1006 = shalt.err (!%p1003_p5)
}
 0x132   : > { %s1007_s6 = scalar_lea.hbm %s1242_s18, 768  ;;  %s1011_s16 = scalar_lea.hbm %s1292_s2, 1536 }
 0x133   : > { %p1008_p7 = scmp.ne.s32.totalorder %s1242_s18, %s1007_s6  ;;  %p1012_p9 = scmp.lt.s32.totalorder %s1242_s18, %s1292_s2 }
 0x134   : > { %p1013_p11 = scmp.lt.s32.totalorder %s1011_s16, %s1007_s6 }
 0x135   : > { %p1009_p6 = pnand %p1008_p7, %p1191_p13 }
 0x136   : > { %p1014_p12 = por %p1013_p11, %p1012_p9 }
 0x137   : > { %p1010_p4 = pneg %p1009_p6 }
 0x139   : > { %p1015_p1 = pnand %p1014_p12, %p1010_p4 }
 0x13b   : > { %1018 = shalt.err (!%p1015_p1)
}
 0x13c   : > { %s1087_s17 = smov 192   ;;  %s1088_s19 = smov 12  }
 0x13d   : > { %831 = dma.vmem_to_hbm [thread:$0]  (%p1191_p13), %s1237_s21, 768, %s1242_s18, %s614_s28, %s1087_s17, %s1087_s17, %s1088_s19  }
 0x13e PF: > { %s645_s24 = sand.u32 1, %s1057_s9   ;;  %p1304_p8 = scmp.ne.s32.totalorder %s1297_s20, 0 }
 0x13f   : > { %p1305_p10 = scmp.ge.s32.totalorder %s1077_s14, 2  ;;  %s646_s26 = scalar_lea.sflag [#allocation5], %s645_s24 }
 0x141   : > { %p842_p0 = pnand %p1305_p10, %p1304_p8 }
 0x143   : > { %p843_p2 = pneg %p842_p0 }
 0x145   : > { %1052 = dma.done.wait (%p843_p2), %s646_s26, 768  }
 0x146   : > { %1054 = vsyncadd (%p843_p2), %s646_s26, 4294966528  ;;  %s19_s14 = sadd.s32 1, %s1077_s14   ;;  %s1306_s9 = smov %s1061_s10 }
 0x147   : > { %p16_p3 = scmp.ge.s32.totalorder %s19_s14, 4   ;;  %s1307_s10 = smov %s1065_s11 }
 0x148   : > { %s1308_s11 = smov %s1200_s15  ;;  %s1309_s12 = smov %s1073_s13 }
 0x149   : > { %s1310_s13 = smov %s1312_s25  ;;  %18 = sbr.rel (!%p16_p3) target bundleno = 7 (0x7), region = 86 }
 0x14e   :  { %651 = vsyncpa [#allocation4], 1 }
 0x14f   :  { %653 = vsyncpa [#allocation4 + $0x1], 1 }
 0x150   :  { %654 = vsyncpa [#allocation7], 1 }
 0x151   :  { %655 = vsyncpa [#allocation5], 1 }
 0x152   :  { %657 = vsyncpa [#allocation5 + $0x1], 1 }

</bundles_post_ra>
